<compile_context>
chip_gen: v5e
topology: v5e:2x2
jax: 0.10.0
libtpu: 0.0.40
codegen_flags: <defaults>
</compile_context>

<pallas_src>
import functools

import jax
import jax.numpy as jnp
from jax.experimental import pallas as pl
from jax.experimental.pallas import tpu as pltpu

STATE_DIM = 8
ACTION_DIM = 4
HIDDEN = 100
IN_PAD = 16          # cat(state, action, ones) = 13 rows, padded to 16 (sublane multiple)


def _round_up(x, m):
    return ((x + m - 1) // m) * m


def _rknn2_kernel(xT_ref, w1p_ref, w2T_ref, w3T_ref, b23_ref, beta_ref, out_ref):
    # [feature, batch] layout: lane axis carries the batch.
    xT = xT_ref[...]                 # (16, blk): rows = [state(8) | action(4) | 1 | 0 0 0]
    w1p = w1p_ref[...]               # (HP, 16):  cols = [W1s^T | W1a^T | b1 | 0 0 0]
    w2T = w2T_ref[...]               # (HP, HP)
    w3T = w3T_ref[...]               # (S,  HP)
    b2 = b23_ref[:, 0:1]             # (HP, 1) -> lane-broadcast at the add (not materialized)
    b3 = b23_ref[:STATE_DIM, 1:2]    # (S, 1)

    def f(x16):
        # Layer-1 bias folded into w1p via the ones row of x16: one K=16 MXU push.
        h = jnp.dot(w1p, x16, preferred_element_type=jnp.float32)
        h = jnp.maximum(h, 0.0)
        h = jnp.dot(w2T, h, preferred_element_type=jnp.float32) + b2
        h = jnp.maximum(h, 0.0)
        return jnp.dot(w3T, h, preferred_element_type=jnp.float32) + b3

    sT = xT[:STATE_DIM, :]           # (8, blk)
    k1 = f(xT)                       # (8, blk)

    # K2: f(cat(s,a) + cat(K1,a)) == f_split(s + K1, 2*a).
    # Tail rows of the stacked input: action rows x2, ones row stays 1, pad stays 0.
    tail = xT[STATE_DIM:, :]         # (8, blk) = [action(4); 1; 0 0 0]
    ridx = jax.lax.broadcasted_iota(jnp.int32, (tail.shape[0], 1), 0)
    tail_scale = jnp.where(ridx < ACTION_DIM, 2.0,
                           jnp.where(ridx == ACTION_DIM, 1.0, 0.0)).astype(jnp.float32)
    x2 = jnp.concatenate([sT + k1, tail * tail_scale], axis=0)   # (16, blk)
    k2 = f(x2)

    beta = beta_ref[0]
    out_ref[...] = sT + beta * k1 + (1.0 - beta) * k2


def _pick_block_b(B):
    Bp = _round_up(B, 128)
    if Bp <= 256:
        return Bp                                  # one lane-dense tile
    if Bp <= 4096:
        return _round_up((Bp + 1) // 2, 128)       # two tiles -> both v7x TCs busy
    nb = -(-Bp // 2048)                            # cap streaming dim at 2048 lanes/tile
    if nb % 2:
        nb += 1                                    # even tile count for v7x megacore
    return _round_up(-(-Bp // nb), 128)


def pack_params(params):
    """One-time weight prep (transpose + pad into kernel layout) -- NOT per call."""
    w1s, w1a, b1, w2, b2, w3, b3, beta = params
    S, H = w1s.shape
    A = w1a.shape[0]
    HP = _round_up(H, 128)
    f32 = jnp.float32

    w1p = jnp.zeros((HP, IN_PAD), f32)
    w1p = w1p.at[:H, :S].set(w1s.T.astype(f32))
    w1p = w1p.at[:H, S:S + A].set(w1a.T.astype(f32))
    w1p = w1p.at[:H, S + A].set(b1.reshape(H).astype(f32))   # bias via ones row

    w2T = jnp.zeros((HP, HP), f32).at[:H, :H].set(w2.T.astype(f32))
    w3T = jnp.zeros((S, HP), f32).at[:, :H].set(w3.T.astype(f32))

    b23 = jnp.zeros((HP, 2), f32)
    b23 = b23.at[:H, 0].set(b2.reshape(H).astype(f32))
    b23 = b23.at[:S, 1].set(b3.reshape(S).astype(f32))

    return (w1p, w2T, w3T, b23, beta.astype(f32))


@functools.partial(jax.jit, static_argnums=(3,))
def _forward_impl(state, action, packed, block_b):
    w1p, w2T, w3T, b23, beta = packed
    B = state.shape[0]
    S, A = STATE_DIM, ACTION_DIM
    HP = w2T.shape[0]
    Bp = _round_up(B, block_b)
    nb = Bp // block_b
    f32 = jnp.float32

    # Stacked transposed activation slab [state; action; 1; 0] (16, Bp).
    # Under jit the pad + transpose fuse into one copy feeding the pallas_call.
    # TODO(synk): for multi-step rollouts keep this [feature, batch] layout
    # end-to-end instead of re-transposing around every step.
    xT = jnp.zeros((IN_PAD, Bp), f32)
    xT = xT.at[:S, :B].set(state.T.astype(f32))
    xT = xT.at[S:S + A, :B].set(action.T.astype(f32))
    xT = xT.at[S + A, :B].set(1.0)

    full = lambda shape: pl.BlockSpec(shape, lambda i: (0, 0))
    out = pl.pallas_call(
        _rknn2_kernel,
        out_shape=jax.ShapeDtypeStruct((S, Bp), f32),
        grid=(nb,),
        in_specs=[
            pl.BlockSpec((IN_PAD, block_b), lambda i: (0, i)),   # stacked input tile
            full((HP, IN_PAD)),    # W1 packed (state | action | b1)
            full((HP, HP)),        # W2^T
            full((S, HP)),         # W3^T
            full((HP, 2)),         # [b2 | b3] columns
            pl.BlockSpec(memory_space=pltpu.MemorySpace.SMEM),   # beta scalar
        ],
        out_specs=pl.BlockSpec((S, block_b), lambda i: (0, i)),
        compiler_params=pltpu.CompilerParams(
            dimension_semantics=("parallel",),
            vmem_limit_bytes=32 << 20),
    )(xT, w1p, w2T, w3T, b23, beta)

    return out[:, :B].T


def rknn2_forward(state, action, packed_params, *, block_b=None):
    """state: (B, STATE_DIM), action: (B, ACTION_DIM) -> (B, STATE_DIM)."""
    if block_b is None:
        block_b = _pick_block_b(state.shape[0])
    return _forward_impl(state, action, packed_params, block_b)


def init_params(key, state_dim=STATE_DIM, action_dim=ACTION_DIM, hidden=HIDDEN):
    """Deterministic init mimicking torch.nn.Linear default (U[-1/sqrt(fan_in), +])."""
    ks = jax.random.split(key, 6)
    in_dim = state_dim + action_dim

    def lin(kw, kb, fan_in, fan_out):
        bound = 1.0 / jnp.sqrt(jnp.float32(fan_in))
        w = jax.random.uniform(kw, (fan_in, fan_out), jnp.float32, -bound, bound)
        b = jax.random.uniform(kb, (1, fan_out), jnp.float32, -bound, bound)
        return w, b

    w1, b1 = lin(ks[0], ks[1], in_dim, hidden)
    w2, b2 = lin(ks[2], ks[3], hidden, hidden)
    w3, b3 = lin(ks[4], ks[5], hidden, state_dim)

    w1s = w1[:state_dim]       # rows acting on the state part of the concat
    w1a = w1[state_dim:]       # rows acting on the action part of the concat
    beta = jnp.full((1,), 0.5, jnp.float32)   # self.beta_1.data.fill_(0.5)
    return (w1s, w1a, b1, w2, b2, w3, b3, beta)


def reference_forward(state, action, params):
    """Plain-JAX reference mirroring the PyTorch forward exactly."""
    w1s, w1a, b1, w2, b2, w3, b3, beta = params
    w1 = jnp.concatenate([w1s, w1a], axis=0)

    def f(x):
        h = jnp.maximum(x @ w1 + b1, 0.0)
        h = jnp.maximum(h @ w2 + b2, 0.0)
        return h @ w3 + b3

    sa = jnp.concatenate([state, action], axis=1)
    k1 = f(sa)
    k1_action = jnp.concatenate([k1, action], axis=1)
    k2 = f(sa + k1_action)
    b = beta[0]
    return state + b * k1 + (1.0 - b) * k2


if __name__ == "__main__":
    key = jax.random.PRNGKey(0)
    kp, ks, ka = jax.random.split(key, 3)

    params = init_params(kp)
    packed = pack_params(params)   # one-time weight prep, hoisted out of the call path

    # Small canonical case from the module spec.
    B = 2
    state = jax.random.normal(ks, (B, STATE_DIM), jnp.float32)
    action = jax.random.normal(ka, (B, ACTION_DIM), jnp.float32)
    out = jax.block_until_ready(rknn2_forward(state, action, packed))
    ref = reference_forward(state, action, params)
    assert out.shape == (B, STATE_DIM)
    assert jnp.allclose(out, ref, atol=1e-4, rtol=1e-4), "mismatch vs reference (B=2)"

    # Ragged multi-tile case: even tile count (grid=2) + padded last tile.
    B2 = 257
    state2 = jax.random.normal(ks, (B2, STATE_DIM), jnp.float32)
    action2 = jax.random.normal(ka, (B2, ACTION_DIM), jnp.float32)
    out2 = jax.block_until_ready(rknn2_forward(state2, action2, packed))
    ref2 = reference_forward(state2, action2, params)
    assert out2.shape == (B2, STATE_DIM)
    assert jnp.allclose(out2, ref2, atol=1e-4, rtol=1e-4), "mismatch vs reference (B=257)"

    print("KERNEL_OK")
</pallas_src>

<mosaic_0001>
module attributes {stable_mosaic.version = 11 : i64} {
  func.func @_rknn2_kernel(%arg0: i32, %arg1: memref<16x128xf32, #tpu.memory_space<vmem>>, %arg2: memref<128x16xf32, #tpu.memory_space<vmem>>, %arg3: memref<128x128xf32, #tpu.memory_space<vmem>>, %arg4: memref<8x128xf32, #tpu.memory_space<vmem>>, %arg5: memref<128x2xf32, #tpu.memory_space<vmem>>, %arg6: memref<1xf32, #tpu.memory_space<smem>>, %arg7: memref<8x128xf32, #tpu.memory_space<vmem>>) attributes {dimension_semantics = [#tpu.dimension_semantics<parallel>], iteration_bounds = array<i64: 1>, scalar_prefetch = 0 : i64, scratch_operands = 0 : i64, tpu.core_type = #tpu.core_type<tc>, window_params = [{transform_indices = @transform_0, window_bounds = array<i64: 16, 128>}, {pipeline_mode = #tpu.pipeline_mode<synchronous>, transform_indices = @transform_1, window_bounds = array<i64: 128, 16>}, {pipeline_mode = #tpu.pipeline_mode<synchronous>, transform_indices = @transform_2, window_bounds = array<i64: 128, 128>}, {pipeline_mode = #tpu.pipeline_mode<synchronous>, transform_indices = @transform_3, window_bounds = array<i64: 8, 128>}, {pipeline_mode = #tpu.pipeline_mode<synchronous>, transform_indices = @transform_4, window_bounds = array<i64: 128, 2>}, {transform_indices = @transform_5, window_bounds = array<i64: 1>}, {transform_indices = @transform_6, window_bounds = array<i64: 8, 128>}]} {
    %c0 = arith.constant 0 : index
    %c0_0 = arith.constant 0 : index
    %0 = vector.load %arg1[%c0, %c0_0] : memref<16x128xf32, #tpu.memory_space<vmem>>, vector<16x128xf32>
    %c0_1 = arith.constant 0 : index
    %c0_2 = arith.constant 0 : index
    %1 = vector.load %arg2[%c0_1, %c0_2] : memref<128x16xf32, #tpu.memory_space<vmem>>, vector<128x16xf32>
    %c0_3 = arith.constant 0 : index
    %c0_4 = arith.constant 0 : index
    %2 = vector.load %arg3[%c0_3, %c0_4] : memref<128x128xf32, #tpu.memory_space<vmem>>, vector<128x128xf32>
    %c0_5 = arith.constant 0 : index
    %c0_6 = arith.constant 0 : index
    %3 = vector.load %arg4[%c0_5, %c0_6] : memref<8x128xf32, #tpu.memory_space<vmem>>, vector<8x128xf32>
    %c0_7 = arith.constant 0 : index
    %c0_8 = arith.constant 0 : index
    %4 = vector.load %arg5[%c0_7, %c0_8] : memref<128x2xf32, #tpu.memory_space<vmem>>, vector<128x1xf32>
    %c0_9 = arith.constant 0 : index
    %c1 = arith.constant 1 : index
    %5 = vector.load %arg5[%c0_9, %c1] : memref<128x2xf32, #tpu.memory_space<vmem>>, vector<8x1xf32>
    %6 = vector.extract_strided_slice %0 {offsets = [0, 0], sizes = [8, 128], strides = [1, 1]} : vector<16x128xf32> to vector<8x128xf32>
    %cst = arith.constant dense<0.000000e+00> : vector<128x128xf32>
    %7 = tpu.matmul %1, %0, %cst {dimension_numbers = #tpu.dot_dimension_numbers<[1], [0], [0], [1], [0, 0, 1, 1], [], []>} : vector<128x16xf32>, vector<16x128xf32>, vector<128x128xf32> -> vector<128x128xf32>
    %cst_10 = arith.constant 0.000000e+00 : f32
    %8 = vector.broadcast %cst_10 : f32 to vector<128x128xf32>
    %9 = arith.maximumf %7, %8 : vector<128x128xf32>
    %cst_11 = arith.constant dense<0.000000e+00> : vector<128x128xf32>
    %10 = tpu.matmul %2, %9, %cst_11 {dimension_numbers = #tpu.dot_dimension_numbers<[1], [0], [0], [1], [0, 0, 1, 1], [], []>} : vector<128x128xf32>, vector<128x128xf32>, vector<128x128xf32> -> vector<128x128xf32>
    %11 = vector.broadcast %4 : vector<128x1xf32> to vector<128x128xf32>
    %12 = arith.addf %10, %11 : vector<128x128xf32>
    %cst_12 = arith.constant 0.000000e+00 : f32
    %13 = vector.broadcast %cst_12 : f32 to vector<128x128xf32>
    %14 = arith.maximumf %12, %13 : vector<128x128xf32>
    %cst_13 = arith.constant dense<0.000000e+00> : vector<8x128xf32>
    %15 = tpu.matmul %3, %14, %cst_13 {dimension_numbers = #tpu.dot_dimension_numbers<[1], [0], [0], [1], [0, 0, 1, 1], [], []>} : vector<8x128xf32>, vector<128x128xf32>, vector<8x128xf32> -> vector<8x128xf32>
    %16 = vector.broadcast %5 : vector<8x1xf32> to vector<8x128xf32>
    %17 = arith.addf %15, %16 : vector<8x128xf32>
    %18 = vector.extract_strided_slice %0 {offsets = [8, 0], sizes = [8, 128], strides = [1, 1]} : vector<16x128xf32> to vector<8x128xf32>
    %19 = tpu.iota {dimensions = array<i32: 0>} : vector<8x1xi32>
    %c4_i32 = arith.constant 4 : i32
    %20 = vector.broadcast %c4_i32 : i32 to vector<8x1xi32>
    %21 = arith.cmpi slt, %19, %20 : vector<8x1xi32>
    %c4_i32_14 = arith.constant 4 : i32
    %22 = vector.broadcast %c4_i32_14 : i32 to vector<8x1xi32>
    %23 = arith.cmpi eq, %19, %22 : vector<8x1xi32>
    %cst_15 = arith.constant 1.000000e+00 : f32
    %cst_16 = arith.constant 0.000000e+00 : f32
    %24 = vector.broadcast %cst_15 : f32 to vector<8x1xf32>
    %25 = vector.broadcast %cst_16 : f32 to vector<8x1xf32>
    %26 = arith.select %23, %24, %25 : vector<8x1xi1>, vector<8x1xf32>
    %cst_17 = arith.constant 2.000000e+00 : f32
    %27 = vector.broadcast %cst_17 : f32 to vector<8x1xf32>
    %28 = arith.select %21, %27, %26 : vector<8x1xi1>, vector<8x1xf32>
    %29 = arith.addf %6, %17 : vector<8x128xf32>
    %30 = vector.broadcast %28 : vector<8x1xf32> to vector<8x128xf32>
    %31 = arith.mulf %18, %30 : vector<8x128xf32>
    %32 = tpu.concatenate %29, %31 in 0 : vector<8x128xf32>, vector<8x128xf32> -> vector<16x128xf32>
    %cst_18 = arith.constant dense<0.000000e+00> : vector<128x128xf32>
    %33 = tpu.matmul %1, %32, %cst_18 {dimension_numbers = #tpu.dot_dimension_numbers<[1], [0], [0], [1], [0, 0, 1, 1], [], []>} : vector<128x16xf32>, vector<16x128xf32>, vector<128x128xf32> -> vector<128x128xf32>
    %cst_19 = arith.constant 0.000000e+00 : f32
    %34 = vector.broadcast %cst_19 : f32 to vector<128x128xf32>
    %35 = arith.maximumf %33, %34 : vector<128x128xf32>
    %cst_20 = arith.constant dense<0.000000e+00> : vector<128x128xf32>
    %36 = tpu.matmul %2, %35, %cst_20 {dimension_numbers = #tpu.dot_dimension_numbers<[1], [0], [0], [1], [0, 0, 1, 1], [], []>} : vector<128x128xf32>, vector<128x128xf32>, vector<128x128xf32> -> vector<128x128xf32>
    %37 = vector.broadcast %4 : vector<128x1xf32> to vector<128x128xf32>
    %38 = arith.addf %36, %37 : vector<128x128xf32>
    %cst_21 = arith.constant 0.000000e+00 : f32
    %39 = vector.broadcast %cst_21 : f32 to vector<128x128xf32>
    %40 = arith.maximumf %38, %39 : vector<128x128xf32>
    %cst_22 = arith.constant dense<0.000000e+00> : vector<8x128xf32>
    %41 = tpu.matmul %3, %40, %cst_22 {dimension_numbers = #tpu.dot_dimension_numbers<[1], [0], [0], [1], [0, 0, 1, 1], [], []>} : vector<8x128xf32>, vector<128x128xf32>, vector<8x128xf32> -> vector<8x128xf32>
    %42 = vector.broadcast %5 : vector<8x1xf32> to vector<8x128xf32>
    %43 = arith.addf %41, %42 : vector<8x128xf32>
    %c0_23 = arith.constant 0 : index
    %44 = memref.load %arg6[%c0_23] : memref<1xf32, #tpu.memory_space<smem>>
    %45 = vector.broadcast %44 : f32 to vector<8x128xf32>
    %46 = arith.mulf %45, %17 : vector<8x128xf32>
    %47 = arith.addf %6, %46 : vector<8x128xf32>
    %cst_24 = arith.constant 1.000000e+00 : f32
    %48 = arith.subf %cst_24, %44 : f32
    %49 = vector.broadcast %48 : f32 to vector<8x128xf32>
    %50 = arith.mulf %49, %43 : vector<8x128xf32>
    %51 = arith.addf %47, %50 : vector<8x128xf32>
    %c0_25 = arith.constant 0 : index
    %c0_26 = arith.constant 0 : index
    %52 = vector.load %arg7[%c0_25, %c0_26] : memref<8x128xf32, #tpu.memory_space<vmem>>, vector<8x128xf32>
    tpu.vector_store %arg7[%c0_25, %c0_26], %51 {strides = array<i32>} : memref<8x128xf32, #tpu.memory_space<vmem>>, vector<8x128xf32>,
    return
  }
  func.func @transform_0(%arg0: i32) -> (i32, i32) {
    %c0_i32 = arith.constant 0 : i32
    %c0_i32_0 = arith.constant 0 : i32
    return %c0_i32, %arg0 : i32, i32
  }
  func.func @transform_1(%arg0: i32) -> (i32, i32) {
    %c0_i32 = arith.constant 0 : i32
    %c0_i32_0 = arith.constant 0 : i32
    %c0_i32_1 = arith.constant 0 : i32
    return %c0_i32, %c0_i32_0 : i32, i32
  }
  func.func @transform_2(%arg0: i32) -> (i32, i32) {
    %c0_i32 = arith.constant 0 : i32
    %c0_i32_0 = arith.constant 0 : i32
    %c0_i32_1 = arith.constant 0 : i32
    return %c0_i32, %c0_i32_0 : i32, i32
  }
  func.func @transform_3(%arg0: i32) -> (i32, i32) {
    %c0_i32 = arith.constant 0 : i32
    %c0_i32_0 = arith.constant 0 : i32
    %c0_i32_1 = arith.constant 0 : i32
    return %c0_i32, %c0_i32_0 : i32, i32
  }
  func.func @transform_4(%arg0: i32) -> (i32, i32) {
    %c0_i32 = arith.constant 0 : i32
    %c0_i32_0 = arith.constant 0 : i32
    %c0_i32_1 = arith.constant 0 : i32
    return %c0_i32, %c0_i32_0 : i32, i32
  }
  func.func @transform_5(%arg0: i32) -> i32 {
    %c0_i32 = arith.constant 0 : i32
    %c0_i32_0 = arith.constant 0 : i32
    return %c0_i32 : i32
  }
  func.func @transform_6(%arg0: i32) -> (i32, i32) {
    %c0_i32 = arith.constant 0 : i32
    %c0_i32_0 = arith.constant 0 : i32
    return %c0_i32, %arg0 : i32, i32
  }
}

</mosaic_0001>

<bundles_post_ra>
// kernel: _forward_impl.1
= control target key start
LH: loop header
LB: loop body
LE: loop exit
PB: predicated region body
PF: predicated region fallthrough
CT: control target
= control target key end

     0   :  { %vm75_vm0 = vcmask 130048   ;;  %v649_v31 = vmov 0   ;;  %s1125_s0 = inlined_call_operand.vmem [shape: f32[16,128], index: 0, kind: input, shape index: {}]   ;;  %s1126_s1 = inlined_call_operand.vmem [shape: f32[128,16], index: 1, kind: input, shape index: {}]   ;;  %s1127_s4 = inlined_call_operand.vmem [shape: f32[128,2], index: 4, kind: input, shape index: {}]   ;;  %s1128_s2 = inlined_call_operand.vmem [shape: f32[128,128], index: 2, kind: input, shape index: {}]   ;;  %s1129_s3 = inlined_call_operand.vmem [shape: f32[8,128], index: 3, kind: input, shape index: {}]   ;;  %s1130_s5 = inlined_call_operand.<no memory space> [shape: f32[1], index: 5, kind: input, shape index: {}]   ;;  %s1131_s6 = inlined_call_operand.vmem [shape: f32[8,128], index: 6, kind: output, shape index: {}]  }
   0x1   :  { %v690_v0 = vld [vmem:[%s1125_s0 + $0x8] sm:$0xff]  ;;  %v695_v1 = vld [vmem:[%s1125_s0] sm:$0xff]  ;;  %v716_v4 = vld [vmem:[%s1126_s1 + $0x10] sm:$0xff]  ;;  %644 = vset.pattern.permute.xlu0 %v649_v31  ;;  %645 = vset.pattern.permute.xlu1 %v649_v31  ;;  %s584_s21 = ssub.f32 1.0, %s1130_s5 }
   0x2   :  { %138 = vmatpush.msra.mxu0 %v690_v0  ;;  %v701_v2 = vld [vmem:[%s1126_s1] sm:$0xff]  ;;  %v709_v3 = vld [vmem:[%s1126_s1 + $0x8] sm:$0xff]  ;;  %v723_v5 = vld [vmem:[%s1126_s1 + $0x18] sm:$0xff]  ;;  %646 = vset.pattern.permute.xlu2 %v649_v31 }
   0x3   :  { %v730_v6 = vld [vmem:[%s1126_s1 + $0x20] sm:$0xff]  ;;  %v737_v7 = vld [vmem:[%s1126_s1 + $0x28] sm:$0xff]  ;;  %v744_v8 = vld [vmem:[%s1126_s1 + $0x30] sm:$0xff] }
   0x4   :  { %139 = vmatpush.msra.mxu0 %v695_v1  ;;  %v751_v9 = vld [vmem:[%s1126_s1 + $0x38] sm:$0xff]  ;;  %v758_v10 = vld [vmem:[%s1126_s1 + $0x40] sm:$0xff]  ;;  %v765_v11 = vld [vmem:[%s1126_s1 + $0x48] sm:$0xff] }
   0x5   :  { %593 = vmatmul.msk.f32.vlgmr.msra.gmra.mxu0 %vm75_vm0, %v701_v2  ;;  %v772_v12 = vld [vmem:[%s1126_s1 + $0x50] sm:$0xff]  ;;  %v779_v13 = vld [vmem:[%s1126_s1 + $0x58] sm:$0xff]  ;;  %v786_v14 = vld [vmem:[%s1126_s1 + $0x60] sm:$0xff] }
   0x6   :  { %v793_v15 = vld [vmem:[%s1126_s1 + $0x68] sm:$0xff]  ;;  %v800_v16 = vld [vmem:[%s1126_s1 + $0x70] sm:$0xff]  ;;  %v807_v17 = vld [vmem:[%s1126_s1 + $0x78] sm:$0xff] }
   0x7   :  { %v74_v30 = vld [vmem:[%s1127_s4 + $0x78] sm:$0xff]  ;;  %v73_v33 = vld [vmem:[%s1127_s4 + $0x70] sm:$0xff]  ;;  %v68_v35 = vld [vmem:[%s1127_s4 + $0x48] sm:$0xff] }
   0x8   :  { %282 = vperm.xlu0 %644, %v74_v30   ;;  %v72_v37 = vld [vmem:[%s1127_s4 + $0x68] sm:$0xff]  ;;  %v65_v38 = vld [vmem:[%s1127_s4 + $0x30] sm:$0xff]  ;;  %v71_v41 = vld [vmem:[%s1127_s4 + $0x60] sm:$0xff] }
   0x9   :  { %272 = vperm.xlu1 %645, %v72_v37   ;;  %v62_v42 = vld [vmem:[%s1127_s4 + $0x18] sm:$0xff]  ;;  %v67_v48 = vld [vmem:[%s1127_s4 + $0x40] sm:$0xff]  ;;  %v69_v54 = vld [vmem:[%s1127_s4 + $0x50] sm:$0xff] }
   0xa   :  { %v70_v47 = vld [vmem:[%s1127_s4 + $0x58] sm:$0xff]  ;;  %v851_v49 = vld [vmem:[%s1127_s4] sm:$0xff]  ;;  %v64_v55 = vld [vmem:[%s1127_s4 + $0x28] sm:$0xff] }
   0xb   :  { %262 = vperm.xlu2 %646, %v70_v47   ;;  %v66_v60 = vld [vmem:[%s1127_s4 + $0x38] sm:$0xff]  ;;  %v61_v61 = vld [vmem:[%s1127_s4 + $0x10] sm:$0xff]  ;;  %v934_v30 = vld [vmem:[%s1128_s2 + $0x48] sm:$0xff] }
   0xc   :  { %1139 = vst [vmem:[#allocation4_spill] sm:$0xff] %v934_v30  ;;  %v940_v31 = vld [vmem:[%s1128_s2 + $0x50] sm:$0xff] }
   0xd   :  { %594 = vmatmul.msk.f32.gmra.mxu0 %vm75_vm0, %v709_v3  ;;  %1140 = vst [vmem:[#allocation5_spill] sm:$0xff] %v940_v31 }
  0x10   :  { %277 = vperm.xlu0 %644, %v73_v33   ;;  %v952_v33 = vld [vmem:[%s1128_s2 + $0x60] sm:$0xff] }
  0x11   :  { %267 = vperm.xlu1 %645, %v71_v41  }
  0x13   :  { %257 = vperm.xlu2 %646, %v69_v54  }
  0x15   :  { %595 = vmatmul.msk.f32.gmra.mxu0 %vm75_vm0, %v716_v4 }
  0x18   :  { %252 = vperm.xlu0 %644, %v68_v35   ;;  %v964_v35 = vld [vmem:[%s1128_s2 + $0x70] sm:$0xff] }
  0x19   :  { %247 = vperm.xlu1 %645, %v67_v48  }
  0x1b   :  { %242 = vperm.xlu2 %646, %v66_v60  }
  0x1d   :  { %596 = vmatmul.msk.f32.gmra.mxu0 %vm75_vm0, %v723_v5 }
  0x20   :  { %237 = vperm.xlu0 %644, %v65_v38  }
  0x21   :  { %232 = vperm.xlu1 %645, %v64_v55  }
  0x25   :  { %597 = vmatmul.msk.f32.gmra.mxu0 %vm75_vm0, %v730_v6 }
  0x28   :  { %222 = vperm.xlu0 %644, %v62_v42  }
  0x29   :  { %217 = vperm.xlu1 %645, %v61_v61  }
  0x2d   :  { %598 = vmatmul.msk.f32.gmra.mxu0 %vm75_vm0, %v737_v7 }
  0x30   :  { %207 = vperm.xlu0 %644, %v851_v49  }
  0x35   :  { %599 = vmatmul.msk.f32.gmra.mxu0 %vm75_vm0, %v744_v8 }
  0x3d   :  { %600 = vmatmul.msk.f32.gmra.mxu0 %vm75_vm0, %v751_v9 }
  0x45   :  { %601 = vmatmul.msk.f32.gmra.mxu0 %vm75_vm0, %v758_v10 }
  0x4d   :  { %602 = vmatmul.msk.f32.gmra.mxu0 %vm75_vm0, %v765_v11 }
  0x55   :  { %603 = vmatmul.msk.f32.gmra.mxu0 %vm75_vm0, %v772_v12 }
  0x5d   :  { %604 = vmatmul.msk.f32.gmra.mxu0 %vm75_vm0, %v779_v13 }
  0x65   :  { %605 = vmatmul.msk.f32.gmra.mxu0 %vm75_vm0, %v786_v14 }
  0x6d   :  { %606 = vmatmul.msk.f32.gmra.mxu0 %vm75_vm0, %v793_v15 }
  0x75   :  { %607 = vmatmul.msk.f32.gmra.mxu0 %vm75_vm0, %v800_v16 }
  0x7d   :  { %608 = vmatmul.msk.f32.gmra.mxu0 %vm75_vm0, %v807_v17 }
  0x82   :  { %v811_v18 = vpop.f32.mrf.mxu0 }
  0x8a   :  { %v813_v19 = vpop.f32.mrf.mxu0 }
  0x8b   :  { %v190_v63 = vmax.f32 %v813_v19, 0.0  ;;  %v883_v19 = vld [vmem:[%s1128_s2 + $0x8] sm:$0xff] }
  0x92   :  { %v815_v20 = vpop.f32.mrf.mxu0 }
  0x93   :  { %v191_v62 = vmax.f32 %v815_v20, 0.0  ;;  %v63_v20 = vld [vmem:[%s1127_s4 + $0x20] sm:$0xff] }
  0x94   :  { %227 = vperm.xlu2 %646, %v63_v20  }
  0x9a   :  { %v817_v21 = vpop.f32.mrf.mxu0 }
  0x9b   :  { %v192_v59 = vmax.f32 %v817_v21, 0.0  ;;  %v874_v21 = vld [vmem:[%s1128_s2] sm:$0xff] }
  0xa2   :  { %v819_v22 = vpop.f32.mrf.mxu0 }
  0xa3   :  { %v193_v58 = vmax.f32 %v819_v22, 0.0  ;;  %v189_v22 = vmax.f32 %v811_v18, 0.0  ;;  %v60_v18 = vld [vmem:[%s1127_s4 + $0x8] sm:$0xff] }
  0xa4   :  { %212 = vperm.xlu2 %646, %v60_v18  }
  0xaa   :  { %v156_v23 = vpop.f32.mrf.mxu0 }
  0xab   :  { %v194_v57 = vmax.f32 %v156_v23, 0.0  ;;  %v892_v23 = vld [vmem:[%s1128_s2 + $0x10] sm:$0xff] }
  0xb2   :  { %v159_v24 = vpop.f32.mrf.mxu0 }
  0xb3   :  { %v195_v56 = vmax.f32 %v159_v24, 0.0  ;;  %v898_v24 = vld [vmem:[%s1128_s2 + $0x18] sm:$0xff] }
  0xba   :  { %v162_v25 = vpop.f32.mrf.mxu0 }
  0xbb   :  { %v196_v53 = vmax.f32 %v162_v25, 0.0  ;;  %v904_v25 = vld [vmem:[%s1128_s2 + $0x20] sm:$0xff] }
  0xc2   :  { %v165_v26 = vpop.f32.mrf.mxu0 }
  0xc3   :  { %v197_v52 = vmax.f32 %v165_v26, 0.0  ;;  %v910_v26 = vld [vmem:[%s1128_s2 + $0x28] sm:$0xff] }
  0xca   :  { %v168_v27 = vpop.f32.mrf.mxu0 }
  0xcb   :  { %v198_v51 = vmax.f32 %v168_v27, 0.0  ;;  %v916_v27 = vld [vmem:[%s1128_s2 + $0x30] sm:$0xff] }
  0xd2   :  { %v171_v28 = vpop.f32.mrf.mxu0 }
  0xd3   :  { %v199_v50 = vmax.f32 %v171_v28, 0.0  ;;  %v922_v28 = vld [vmem:[%s1128_s2 + $0x38] sm:$0xff] }
  0xda   :  { %v174_v29 = vpop.f32.mrf.mxu0 }
  0xdb   :  { %v200_v46 = vmax.f32 %v174_v29, 0.0  ;;  %v928_v29 = vld [vmem:[%s1128_s2 + $0x40] sm:$0xff] }
  0xdc   :  { %1138 = vst [vmem:[#allocation3_spill] sm:$0xff] %v928_v29 }
  0xe2   :  { %v177_v32 = vpop.f32.mrf.mxu0 }
  0xe3   :  { %v201_v45 = vmax.f32 %v177_v32, 0.0  ;;  %v946_v32 = vld [vmem:[%s1128_s2 + $0x58] sm:$0xff] }
  0xe4   :  { %1141 = vst [vmem:[#allocation6_spill] sm:$0xff] %v946_v32 }
  0xea   :  { %v180_v34 = vpop.f32.mrf.mxu0 }
  0xeb   :  { %v202_v44 = vmax.f32 %v180_v34, 0.0  ;;  %v958_v34 = vld [vmem:[%s1128_s2 + $0x68] sm:$0xff] }
  0xf2   :  { %v183_v36 = vpop.f32.mrf.mxu0 }
  0xf3   :  { %v203_v43 = vmax.f32 %v183_v36, 0.0  ;;  %v970_v36 = vld [vmem:[%s1128_s2 + $0x78] sm:$0xff] }
  0xfa   :  { %v186_v39 = vpop.f32.mrf.mxu0 }
  0xfb   :  { %v204_v40 = vmax.f32 %v186_v39, 0.0 }
  0xfd   :  { %285 = vmatpush.msra.mxu1 %v204_v40 }
  0xff   :  { %286 = vmatpush.msra.mxu1 %v203_v43 }
 0x101   :  { %287 = vmatpush.msra.mxu1 %v202_v44 }
 0x103   :  { %288 = vmatpush.msra.mxu1 %v201_v45 }
 0x105   :  { %289 = vmatpush.msra.mxu1 %v200_v46 }
 0x107   :  { %290 = vmatpush.msra.mxu1 %v199_v50  ;;  %v979_v50 = vpop.permute.xlu0 %282 }
 0x109   :  { %291 = vmatpush.msra.mxu1 %v198_v51 }
 0x10b   :  { %292 = vmatpush.msra.mxu1 %v197_v52  ;;  %v981_v52 = vpop.permute.xlu1 %272 }
 0x10c   :  { %1142 = vst [vmem:[#allocation7_spill] sm:$0xff] %v981_v52 }
 0x10d   :  { %293 = vmatpush.msra.mxu1 %v196_v53  ;;  %v983_v53 = vpop.permute.xlu2 %262 }
 0x10f   :  { %294 = vmatpush.msra.mxu1 %v195_v56  ;;  %v985_v55 = vpop.permute.xlu0 %277 }
 0x111   :  { %295 = vmatpush.msra.mxu1 %v194_v57 }
 0x113   :  { %296 = vmatpush.msra.mxu1 %v193_v58  ;;  %v987_v56 = vpop.permute.xlu1 %267 }
 0x114   :  { %1143 = vst [vmem:[#allocation8_spill] sm:$0xff] %v987_v56 }
 0x115   :  { %297 = vmatpush.msra.mxu1 %v192_v59  ;;  %v989_v58 = vpop.permute.xlu2 %257 }
 0x117   :  { %298 = vmatpush.msra.mxu1 %v191_v62  ;;  %v991_v59 = vpop.permute.xlu0 %252 }
 0x119   :  { %299 = vmatpush.msra.mxu1 %v190_v63 }
 0x11b   :  { %300 = vmatpush.msra.mxu1 %v189_v22  ;;  %v995_v63 = vpop.permute.xlu1 %247 }
 0x11c   :  { %301 = vmatmul.f32.vlgmr.msra.gmra.mxu1 %v874_v21 }
 0x11d   :  { %v998_v18 = vpop.permute.xlu2 %242 }
 0x124   :  { %304 = vmatmul.f32.gmra.mxu1 %v883_v19 }
 0x12c   :  { %307 = vmatmul.f32.gmra.mxu1 %v892_v23 }
 0x134   :  { %310 = vmatmul.f32.gmra.mxu1 %v898_v24 }
 0x13c   :  { %313 = vmatmul.f32.gmra.mxu1 %v904_v25 }
 0x144   :  { %316 = vmatmul.f32.gmra.mxu1 %v910_v26 }
 0x14c   :  { %319 = vmatmul.f32.gmra.mxu1 %v916_v27 }
 0x154   :  { %322 = vmatmul.f32.gmra.mxu1 %v922_v28 }
 0x15c   :  { %325 = vmatmul.f32.gmra.mxu1 %v928_v29  ;;  %v1001_v29 = vpop.permute.xlu0 %237 }
 0x164   :  { %328 = vmatmul.f32.gmra.mxu1 %v934_v30  ;;  %v650_v30 = vmov 1  }
 0x165   :  { %647 = vset.pattern.permute.xlu1 %v650_v30  ;;  %648 = vset.pattern.permute.xlu0 %v650_v30 }
 0x166   :  { %367 = vperm.xlu1 %647, %v851_v49   ;;  %v1010_v49 = vpop.permute.xlu2 %227 }
 0x16c   :  { %331 = vmatmul.f32.gmra.mxu1 %v940_v31 }
 0x174   :  { %334 = vmatmul.f32.gmra.mxu1 %v946_v32 }
 0x17c   :  { %337 = vmatmul.f32.gmra.mxu1 %v952_v33 }
 0x184   :  { %340 = vmatmul.f32.gmra.mxu1 %v958_v34 }
 0x18c   :  { %343 = vmatmul.f32.gmra.mxu1 %v964_v35 }
 0x194   :  { %346 = vmatmul.f32.gmra.mxu1 %v970_v36 }
 0x199   :  { %v973_v37 = vpop.f32.mrf.mxu1 }
 0x1a1   :  { %v975_v38 = vpop.f32.mrf.mxu1 }
 0x1a9   :  { %v977_v39 = vpop.f32.mrf.mxu1 }
 0x1b1   :  { %v311_v40 = vpop.f32.mrf.mxu1 }
 0x1b9   :  { %v314_v41 = vpop.f32.mrf.mxu1 }
 0x1c1   :  { %v317_v42 = vpop.f32.mrf.mxu1 }
 0x1c9   :  { %v320_v43 = vpop.f32.mrf.mxu1 }
 0x1d1   :  { %v323_v44 = vpop.f32.mrf.mxu1 }
 0x1d2   :  { %v324_v30 = vadd.f32 %v323_v44, %v998_v18 }
 0x1d9   :  { %v326_v45 = vpop.f32.mrf.mxu1 }
 0x1e1   :  { %v329_v46 = vpop.f32.mrf.mxu1 }
 0x1e9   :  { %v332_v47 = vpop.f32.mrf.mxu1 }
 0x1f1   :  { %v335_v48 = vpop.f32.mrf.mxu1 }
 0x1f9   :  { %v338_v51 = vpop.f32.mrf.mxu1 }
 0x1fa   :  { %v339_v32 = vadd.f32 %v338_v51, %v987_v56 }
 0x201   :  { %v341_v54 = vpop.f32.mrf.mxu1 }
 0x202   :  { %v342_v22 = vadd.f32 %v341_v54, %v981_v52  ;;  %v333_v54 = vadd.f32 %v332_v47, %v989_v58  ;;  %v330_v52 = vadd.f32 %v329_v46, %v991_v59 }
 0x204   :  { %v360_v56 = vmax.f32 %v333_v54, 0.0 }
 0x209   :  { %v344_v57 = vpop.f32.mrf.mxu1 }
 0x20a   :  { %v345_v61 = vadd.f32 %v344_v57, %v985_v55  ;;  %v336_v57 = vadd.f32 %v335_v48, %v983_v53  ;;  %v359_v48 = vmax.f32 %v330_v52, 0.0 }
 0x20c   :  { %v364_v31 = vmax.f32 %v345_v61, 0.0  ;;  %v361_v51 = vmax.f32 %v336_v57, 0.0  ;;  %v1007_v61 = vpop.permute.xlu1 %232 }
 0x20d   :  { %v318_v46 = vadd.f32 %v317_v42, %v1007_v61 }
 0x20f   :  { %v355_v52 = vmax.f32 %v318_v46, 0.0 }
 0x211   :  { %v347_v60 = vpop.f32.mrf.mxu1 }
 0x212   :  { %v348_v62 = vadd.f32 %v347_v60, %v979_v50  ;;  %v363_v60 = vmax.f32 %v342_v22, 0.0  ;;  %v357_v22 = vmax.f32 %v324_v30, 0.0 }
 0x214   :  { %v365_v20 = vmax.f32 %v348_v62, 0.0  ;;  %v362_v62 = vmax.f32 %v339_v32, 0.0  ;;  %v321_v32 = vadd.f32 %v320_v43, %v1001_v29 }
 0x216   :  { %370 = vmatpush.msra.mxu2 %v365_v20  ;;  %v327_v20 = vadd.f32 %v326_v45, %v995_v63  ;;  %v315_v45 = vadd.f32 %v314_v41, %v1010_v49  ;;  %v356_v57 = vmax.f32 %v321_v32, 0.0  ;;  %v651_v32 = vmov 0.0  }
 0x218   :  { %371 = vmatpush.msra.mxu2 %v364_v31  ;;  %v1013_v31 = vpop.permute.xlu0 %222  ;;  %v358_v47 = vmax.f32 %v327_v20, 0.0  ;;  %v354_v54 = vmax.f32 %v315_v45, 0.0 }
 0x219   :  { %v312_v44 = vadd.f32 %v311_v40, %v1013_v31 }
 0x21a   :  { %372 = vmatpush.msra.mxu2 %v363_v60  ;;  %v1018_v60 = vpop.permute.xlu1 %217 }
 0x21b   :  { %v309_v43 = vadd.f32 %v977_v39, %v1018_v60  ;;  %v1034_v39 = vld [vmem:[%s1129_s3] sm:$0xff] }
 0x21c   :  { %373 = vmatpush.msra.mxu2 %v362_v62  ;;  %v353_v62 = vmax.f32 %v312_v44, 0.0 }
 0x21d   :  { %v352_v40 = vmax.f32 %v309_v43, 0.0 }
 0x21e   :  { %374 = vmatpush.msra.mxu2 %v361_v51 }
 0x220   :  { %375 = vmatpush.msra.mxu2 %v360_v56  ;;  %v1021_v56 = vpop.permute.xlu2 %212  ;;  %v1025_v42 = vpop.permute.xlu0 %207 }
 0x221   :  { %v306_v41 = vadd.f32 %v975_v38, %v1021_v56  ;;  %v303_v51 = vadd.f32 %v973_v37, %v1025_v42  ;;  %v390_v38 = vlaneseq }
 0x222   :  { %376 = vmatpush.msra.mxu2 %v359_v48 }
 0x223   :  { %v351_v20 = vmax.f32 %v306_v41, 0.0  ;;  %v350_v30 = vmax.f32 %v303_v51, 0.0  ;;  %v391_v48 = vshrl.u32 %v390_v38, 7 }
 0x224   :  { %377 = vmatpush.msra.mxu2 %v358_v47 }
 0x225   :  { %vm393_vm1 = vcmp.eq.s32.totalorder %v391_v48, 4  ;;  %vm392_vm2 = vcmp.lt.s32.totalorder %v391_v48, 4 }
 0x226   :  { %378 = vmatpush.msra.mxu2 %v357_v22  ;;  %v394_v37 = vsel %vm393_vm1, 1.0, %v651_v32  ;;  %v1038_v22 = vpop.permute.xlu1 %367 }
 0x227   :  { %v395_v47 = vsel %vm392_vm2, 2.0, %v394_v37 }
 0x228   :  { %379 = vmatpush.msra.mxu2 %v356_v57  ;;  %v397_v46 = vmul.f32 %v395_v47, %v690_v0 }
 0x22a   :  { %380 = vmatpush.msra.mxu2 %v355_v52  ;;  %412 = vmatpush.msra.mxu3 %v397_v46 }
 0x22c   :  { %381 = vmatpush.msra.mxu2 %v354_v54 }
 0x22e   :  { %382 = vmatpush.msra.mxu2 %v353_v62 }
 0x230   :  { %383 = vmatpush.msra.mxu2 %v352_v40 }
 0x232   :  { %384 = vmatpush.msra.mxu2 %v351_v20 }
 0x234   :  { %385 = vmatpush.msra.mxu2 %v350_v30 }
 0x235   :  { %386 = vmatmul.f32.vlgmr.msra.gmra.mxu2 %v1034_v39 }
 0x2b8   :  { %v387_v45 = vpop.f32.mrf.mxu2 }
 0x2b9   :  { %v1041_v57 = vadd.f32 %v387_v45, %v1038_v22 }
 0x2bb   :  { %v396_v44 = vadd.f32 %v1041_v57, %v695_v1 }
 0x2bd   :  { %413 = vmatpush.msra.mxu3 %v396_v44 }
 0x2be   :  { %609 = vmatmul.msk.f32.vlgmr.msra.gmra.mxu3 %vm75_vm0, %v701_v2 }
 0x2c6   :  { %610 = vmatmul.msk.f32.gmra.mxu3 %vm75_vm0, %v709_v3 }
 0x2ce   :  { %611 = vmatmul.msk.f32.gmra.mxu3 %vm75_vm0, %v716_v4 }
 0x2d6   :  { %612 = vmatmul.msk.f32.gmra.mxu3 %vm75_vm0, %v723_v5 }
 0x2de   :  { %613 = vmatmul.msk.f32.gmra.mxu3 %vm75_vm0, %v730_v6 }
 0x2e6   :  { %614 = vmatmul.msk.f32.gmra.mxu3 %vm75_vm0, %v737_v7 }
 0x2ee   :  { %615 = vmatmul.msk.f32.gmra.mxu3 %vm75_vm0, %v744_v8 }
 0x2f6   :  { %616 = vmatmul.msk.f32.gmra.mxu3 %vm75_vm0, %v751_v9 }
 0x2fe   :  { %617 = vmatmul.msk.f32.gmra.mxu3 %vm75_vm0, %v758_v10 }
 0x306   :  { %618 = vmatmul.msk.f32.gmra.mxu3 %vm75_vm0, %v765_v11 }
 0x30e   :  { %619 = vmatmul.msk.f32.gmra.mxu3 %vm75_vm0, %v772_v12 }
 0x316   :  { %620 = vmatmul.msk.f32.gmra.mxu3 %vm75_vm0, %v779_v13 }
 0x31e   :  { %621 = vmatmul.msk.f32.gmra.mxu3 %vm75_vm0, %v786_v14 }
 0x326   :  { %622 = vmatmul.msk.f32.gmra.mxu3 %vm75_vm0, %v793_v15 }
 0x32e   :  { %623 = vmatmul.msk.f32.gmra.mxu3 %vm75_vm0, %v800_v16 }
 0x336   :  { %624 = vmatmul.msk.f32.gmra.mxu3 %vm75_vm0, %v807_v17 }
 0x341   :  { %v1077_v0 = vpop.f32.mrf.mxu3 }
 0x342   :  { %v463_v46 = vmax.f32 %v1077_v0, 0.0  ;;  %v1148_v0 = vld [vmem:[#allocation7_spill] sm:$0xff] }
 0x349   :  { %v418_v2 = vpop.f32.mrf.mxu3 }
 0x34a   :  { %v464_v47 = vmax.f32 %v418_v2, 0.0 }
 0x351   :  { %v421_v3 = vpop.f32.mrf.mxu3 }
 0x352   :  { %v465_v37 = vmax.f32 %v421_v3, 0.0 }
 0x359   :  { %v424_v4 = vpop.f32.mrf.mxu3 }
 0x35a   :  { %v466_v32 = vmax.f32 %v424_v4, 0.0  ;;  %v1149_v4 = vld [vmem:[#allocation8_spill] sm:$0xff] }
 0x361   :  { %v427_v5 = vpop.f32.mrf.mxu3 }
 0x362   :  { %v467_v48 = vmax.f32 %v427_v5, 0.0 }
 0x369   :  { %v430_v6 = vpop.f32.mrf.mxu3 }
 0x36a   :  { %v468_v38 = vmax.f32 %v430_v6, 0.0 }
 0x371   :  { %v433_v7 = vpop.f32.mrf.mxu3 }
 0x372   :  { %v469_v30 = vmax.f32 %v433_v7, 0.0 }
 0x379   :  { %v436_v8 = vpop.f32.mrf.mxu3 }
 0x37a   :  { %v470_v20 = vmax.f32 %v436_v8, 0.0 }
 0x381   :  { %v439_v9 = vpop.f32.mrf.mxu3 }
 0x382   :  { %v471_v40 = vmax.f32 %v439_v9, 0.0 }
 0x389   :  { %v442_v10 = vpop.f32.mrf.mxu3 }
 0x38a   :  { %v472_v51 = vmax.f32 %v442_v10, 0.0 }
 0x391   :  { %v445_v11 = vpop.f32.mrf.mxu3 }
 0x392   :  { %v473_v62 = vmax.f32 %v445_v11, 0.0 }
 0x399   :  { %v448_v12 = vpop.f32.mrf.mxu3 }
 0x39a   :  { %v474_v41 = vmax.f32 %v448_v12, 0.0 }
 0x3a1   :  { %v451_v13 = vpop.f32.mrf.mxu3 }
 0x3a2   :  { %v475_v54 = vmax.f32 %v451_v13, 0.0 }
 0x3a9   :  { %v454_v14 = vpop.f32.mrf.mxu3 }
 0x3aa   :  { %v476_v17 = vmax.f32 %v454_v14, 0.0 }
 0x3b1   :  { %v457_v15 = vpop.f32.mrf.mxu3 }
 0x3b2   :  { %v477_v43 = vmax.f32 %v457_v15, 0.0 }
 0x3b9   :  { %v460_v16 = vpop.f32.mrf.mxu3 }
 0x3ba   :  { %v478_v52 = vmax.f32 %v460_v16, 0.0 }
 0x3bc   :  { %479 = vmatpush.msrb.mxu2 %v478_v52  ;;  %625 = vmatpush.msrb.mxu3 %v478_v52 }
 0x3be   :  { %480 = vmatpush.msrb.mxu2 %v477_v43  ;;  %626 = vmatpush.msrb.mxu3 %v477_v43 }
 0x3c0   :  { %481 = vmatpush.msrb.mxu2 %v476_v17  ;;  %627 = vmatpush.msrb.mxu3 %v476_v17 }
 0x3c2   :  { %482 = vmatpush.msrb.mxu2 %v475_v54  ;;  %628 = vmatpush.msrb.mxu3 %v475_v54 }
 0x3c4   :  { %483 = vmatpush.msrb.mxu2 %v474_v41  ;;  %629 = vmatpush.msrb.mxu3 %v474_v41 }
 0x3c6   :  { %484 = vmatpush.msrb.mxu2 %v473_v62  ;;  %630 = vmatpush.msrb.mxu3 %v473_v62 }
 0x3c8   :  { %485 = vmatpush.msrb.mxu2 %v472_v51  ;;  %631 = vmatpush.msrb.mxu3 %v472_v51 }
 0x3ca   :  { %486 = vmatpush.msrb.mxu2 %v471_v40  ;;  %632 = vmatpush.msrb.mxu3 %v471_v40 }
 0x3cc   :  { %487 = vmatpush.msrb.mxu2 %v470_v20  ;;  %633 = vmatpush.msrb.mxu3 %v470_v20 }
 0x3ce   :  { %488 = vmatpush.msrb.mxu2 %v469_v30  ;;  %634 = vmatpush.msrb.mxu3 %v469_v30 }
 0x3d0   :  { %489 = vmatpush.msrb.mxu2 %v468_v38  ;;  %635 = vmatpush.msrb.mxu3 %v468_v38 }
 0x3d2   :  { %490 = vmatpush.msrb.mxu2 %v467_v48  ;;  %636 = vmatpush.msrb.mxu3 %v467_v48 }
 0x3d4   :  { %491 = vmatpush.msrb.mxu2 %v466_v32  ;;  %637 = vmatpush.msrb.mxu3 %v466_v32 }
 0x3d6   :  { %492 = vmatpush.msrb.mxu2 %v465_v37  ;;  %638 = vmatpush.msrb.mxu3 %v465_v37 }
 0x3d8   :  { %493 = vmatpush.msrb.mxu2 %v464_v47  ;;  %639 = vmatpush.msrb.mxu3 %v464_v47 }
 0x3da   :  { %494 = vmatpush.msrb.mxu2 %v463_v46  ;;  %640 = vmatpush.msrb.mxu3 %v463_v46 }
 0x3db   :  { %495 = vmatmul.f32.vlgmr.msrb.gmra.mxu2 %v874_v21  ;;  %531 = vmatmul.f32.vlgmr.msrb.gmra.mxu3 %v952_v33  ;;  %v1144_v21 = vld [vmem:[#allocation3_spill] sm:$0xff]  ;;  %v1146_v33 = vld [vmem:[#allocation5_spill] sm:$0xff] }
 0x3e3   :  { %498 = vmatmul.f32.gmra.mxu2 %v883_v19  ;;  %534 = vmatmul.f32.gmra.mxu3 %v958_v34  ;;  %v1145_v19 = vld [vmem:[#allocation4_spill] sm:$0xff] }
 0x3eb   :  { %501 = vmatmul.f32.gmra.mxu2 %v892_v23  ;;  %537 = vmatmul.f32.gmra.mxu3 %v964_v35  ;;  %v1147_v23 = vld [vmem:[#allocation6_spill] sm:$0xff] }
 0x3f3   :  { %504 = vmatmul.f32.gmra.mxu2 %v898_v24  ;;  %540 = vmatmul.f32.gmra.mxu3 %v970_v36 }
 0x3fb   :  { %507 = vmatmul.f32.gmra.mxu2 %v904_v25 }
 0x403   :  { %510 = vmatmul.f32.gmra.mxu2 %v910_v26 }
 0x40b   :  { %513 = vmatmul.f32.gmra.mxu2 %v916_v27 }
 0x413   :  { %516 = vmatmul.f32.gmra.mxu2 %v922_v28 }
 0x41b   :  { %519 = vmatmul.f32.gmra.mxu2 %v1144_v21 }
 0x423   :  { %522 = vmatmul.f32.gmra.mxu2 %v1145_v19 }
 0x42b   :  { %525 = vmatmul.f32.gmra.mxu2 %v1146_v33 }
 0x433   :  { %528 = vmatmul.f32.gmra.mxu2 %v1147_v23 }
 0x45e   :  { %v496_v34 = vpop.f32.mrf.mxu2  ;;  %v532_v24 = vpop.f32.mrf.mxu3 }
 0x45f   :  { %v533_v5 = vadd.f32 %v532_v24, %v1149_v4 }
 0x461   :  { %v556_v9 = vmax.f32 %v533_v5, 0.0 }
 0x466   :  { %v499_v35 = vpop.f32.mrf.mxu2  ;;  %v535_v36 = vpop.f32.mrf.mxu3 }
 0x467   :  { %v536_v2 = vadd.f32 %v535_v36, %v1148_v0 }
 0x469   :  { %v557_v7 = vmax.f32 %v536_v2, 0.0 }
 0x46e   :  { %v502_v45 = vpop.f32.mrf.mxu2  ;;  %v538_v25 = vpop.f32.mrf.mxu3 }
 0x46f   :  { %v539_v27 = vadd.f32 %v538_v25, %v985_v55 }
 0x471   :  { %v558_v6 = vmax.f32 %v539_v27, 0.0 }
 0x476   :  { %v505_v44 = vpop.f32.mrf.mxu2  ;;  %v541_v26 = vpop.f32.mrf.mxu3 }
 0x477   :  { %v542_v28 = vadd.f32 %v541_v26, %v979_v50 }
 0x479   :  { %v559_v3 = vmax.f32 %v542_v28, 0.0 }
 0x47b   :  { %560 = vmatpush.msrb.mxu0 %v559_v3 }
 0x47d   :  { %561 = vmatpush.msrb.mxu0 %v558_v6 }
 0x47e   :  { %v508_v8 = vpop.f32.mrf.mxu2 }
 0x47f   :  { %562 = vmatpush.msrb.mxu0 %v557_v7 }
 0x481   :  { %563 = vmatpush.msrb.mxu0 %v556_v9 }
 0x486   :  { %v511_v10 = vpop.f32.mrf.mxu2 }
 0x487   :  { %v512_v20 = vadd.f32 %v511_v10, %v1007_v61  ;;  %v497_v61 = vadd.f32 %v496_v34, %v1025_v42  ;;  %v585_v42 = vstv %s584_s21 }
 0x489   :  { %v549_v30 = vmax.f32 %v512_v20, 0.0 }
 0x48e   :  { %v514_v11 = vpop.f32.mrf.mxu2 }
 0x48f   :  { %v515_v51 = vadd.f32 %v514_v11, %v1001_v29  ;;  %v500_v29 = vadd.f32 %v499_v35, %v1021_v56 }
 0x491   :  { %v545_v37 = vmax.f32 %v500_v29, 0.0 }
 0x496   :  { %v517_v12 = vpop.f32.mrf.mxu2 }
 0x497   :  { %v518_v41 = vadd.f32 %v517_v12, %v998_v18  ;;  %v503_v18 = vadd.f32 %v502_v45, %v1018_v60 }
 0x499   :  { %v546_v32 = vmax.f32 %v503_v18, 0.0 }
 0x49e   :  { %v520_v13 = vpop.f32.mrf.mxu2 }
 0x49f   :  { %v521_v17 = vadd.f32 %v520_v13, %v995_v63  ;;  %v506_v63 = vadd.f32 %v505_v44, %v1013_v31  ;;  %v581_v31 = vstv %s1130_s5 }
 0x4a0   :  { %v582_v60 = vmul.f32 %v581_v31, %v1041_v57 }
 0x4a1   :  { %v552_v40 = vmax.f32 %v521_v17, 0.0  ;;  %v547_v48 = vmax.f32 %v506_v63, 0.0 }
 0x4a2   :  { %v583_v46 = vadd.f32 %v582_v60, %v695_v1 }
 0x4a6   :  { %v523_v55 = vpop.f32.mrf.mxu2 }
 0x4a7   :  { %v524_v52 = vadd.f32 %v523_v55, %v991_v59  ;;  %v550_v59 = vmax.f32 %v515_v51, 0.0 }
 0x4a9   :  { %v553_v62 = vmax.f32 %v524_v52, 0.0 }
 0x4ae   :  { %v526_v14 = vpop.f32.mrf.mxu2 }
 0x4af   :  { %v527_v15 = vadd.f32 %v526_v14, %v989_v58  ;;  %v551_v58 = vmax.f32 %v518_v41, 0.0 }
 0x4b1   :  { %v554_v54 = vmax.f32 %v527_v15, 0.0 }
 0x4b6   :  { %v529_v50 = vpop.f32.mrf.mxu2 }
 0x4b7   :  { %v530_v16 = vadd.f32 %v529_v50, %v983_v53  ;;  %v509_v53 = vadd.f32 %v508_v8, %v1010_v49  ;;  %v544_v49 = vmax.f32 %v497_v61, 0.0 }
 0x4b9   :  { %v555_v43 = vmax.f32 %v530_v16, 0.0  ;;  %v548_v38 = vmax.f32 %v509_v53, 0.0 }
 0x4bb   :  { %564 = vmatpush.msrb.mxu0 %v555_v43 }
 0x4bd   :  { %565 = vmatpush.msrb.mxu0 %v554_v54 }
 0x4bf   :  { %566 = vmatpush.msrb.mxu0 %v553_v62 }
 0x4c1   :  { %567 = vmatpush.msrb.mxu0 %v552_v40 }
 0x4c3   :  { %568 = vmatpush.msrb.mxu0 %v551_v58 }
 0x4c5   :  { %569 = vmatpush.msrb.mxu0 %v550_v59 }
 0x4c7   :  { %570 = vmatpush.msrb.mxu0 %v549_v30 }
 0x4c9   :  { %571 = vmatpush.msrb.mxu0 %v548_v38 }
 0x4cb   :  { %572 = vmatpush.msrb.mxu0 %v547_v48 }
 0x4cd   :  { %573 = vmatpush.msrb.mxu0 %v546_v32 }
 0x4cf   :  { %574 = vmatpush.msrb.mxu0 %v545_v37 }
 0x4d1   :  { %575 = vmatpush.msrb.mxu0 %v544_v49 }
 0x4d2   :  { %576 = vmatmul.f32.vlgmr.msrb.gmra.mxu0 %v1034_v39 }
 0x54f   :  { %v577_v56 = vpop.f32.mrf.mxu0 }
 0x550   :  { %v578_v47 = vadd.f32 %v577_v56, %v1038_v22 }
 0x552   :  { %v586_v21 = vmul.f32 %v585_v42, %v578_v47 }
 0x554   :  { %v587_v19 = vadd.f32 %v586_v21, %v583_v46 }
 0x556   :  { %588 = vst [vmem:[%s1131_s6] sm:$0xff] %v587_v19 }

</bundles_post_ra>
